<compile_context>
chip_gen: v7x
topology: tpu7x:2x2x1
jax: 0.10.0
libtpu: 0.0.40
codegen_flags: <defaults>
</compile_context>

<pallas_src>
import functools

import jax
import jax.numpy as jnp
from jax.experimental import pallas as pl
from jax.experimental.pallas import tpu as pltpu


_HAS_BUFFERED = hasattr(pl, "Buffered")
_BUFFERED_OK = None  # decided (and cached) on first forward call


def _round_up(n, m):
    return ((n + m - 1) // m) * m


def _cdiv(a, b):
    return -(-a // b)


# ----------------------------------------------------------------------------
# Kernel: one batch tile, all three layers fused (h1/h2 never leave VMEM).
# ----------------------------------------------------------------------------
def mlp_kernel(x_ref, w1_ref, b1_ref, w2_ref, b2_ref, w3_ref, b3_ref, o_ref):
    # Layer 1: relu(x @ W1 + b1)   (bf16 operands -> MXU, f32 accumulate/VPU)
    h1 = jnp.dot(x_ref[...], w1_ref[...], preferred_element_type=jnp.float32)
    h1 = jnp.maximum(h1 + b1_ref[...], 0.0)
    # Layer 2: relu(h1 @ W2 + b2)
    h2 = jnp.dot(h1.astype(jnp.bfloat16), w2_ref[...],
                 preferred_element_type=jnp.float32)
    h2 = jnp.maximum(h2 + b2_ref[...], 0.0)
    # Layer 3: h2 @ W3 + b3 (no activation)
    out = jnp.dot(h2.astype(jnp.bfloat16), w3_ref[...],
                  preferred_element_type=jnp.float32)
    o_ref[...] = (out + b3_ref[...]).astype(o_ref.dtype)


# ----------------------------------------------------------------------------
# One-time parameter preparation (hoisted out of the forward path):
#   transpose to (in, out), zero-pad feature dims to 128, cast weights to bf16.
# ----------------------------------------------------------------------------
def prepare_params(w1, b1, w2, b2, w3, b3):
    def prep(w, b):
        out_f, in_f = w.shape
        in_p, out_p = _round_up(in_f, 128), _round_up(out_f, 128)
        w_t = jnp.zeros((in_p, out_p), jnp.bfloat16)
        w_t = w_t.at[:in_f, :out_f].set(w.T.astype(jnp.bfloat16))
        b_r = jnp.zeros((1, out_p), jnp.float32)
        b_r = b_r.at[0, :out_f].set(b.astype(jnp.float32))
        return w_t, b_r

    w1_t, b1_r = prep(w1, b1)
    w2_t, b2_r = prep(w2, b2)
    w3_t, b3_r = prep(w3, b3)
    out_dim = w3.shape[0]
    return (w1_t, b1_r, w2_t, b2_r, w3_t, b3_r), out_dim


# ----------------------------------------------------------------------------
# Per-generation VMEM budget and batch tiling.
# ----------------------------------------------------------------------------
def _vmem_limit_bytes():
    # ~75% of physical VMEM, capped at 96 MiB:
    #   v5e/v6e (128 MiB) -> 96 MiB ; v7x (64 MiB) -> 48 MiB.
    cap = 64 << 20  # conservative fallback = v7x physical capacity
    try:
        cap = int(getattr(pltpu.get_tpu_info(), "vmem_capacity_bytes", cap))
    except Exception:
        pass
    return int(min(cap * 3 // 4, 96 << 20))


def _choose_tiling(batch, cap=512, min_split=256):
    """Pick (tile_b, b_pad): tile_b multiple of 8, <= cap. For batches large
    enough to split (>= 2*min_split rows) the number of grid steps is made
    even so the 'parallel' batch axis shards across both v7x TensorCores."""
    b_al = _round_up(batch, 8)
    steps = _cdiv(b_al, cap)
    if b_al >= 2 * min_split and steps % 2 == 1:
        steps += 1
    tile_b = _round_up(_cdiv(b_al, steps), 8)
    b_pad = tile_b * _cdiv(b_al, tile_b)
    return tile_b, b_pad


# ----------------------------------------------------------------------------
# Forward: flatten, pad (if needed), run the fused kernel, slice back.
# ----------------------------------------------------------------------------
@functools.partial(jax.jit,
                   static_argnames=("out_dim", "out_dtype", "use_buffered"))
def _mlp_forward_impl(x, prepared, *, out_dim, out_dtype, use_buffered):
    w1_t, b1_r, w2_t, b2_r, w3_t, b3_r = prepared

    B = x.shape[0]
    x2d = x.reshape(B, -1)                               # torch .view(B, -1)
    in_dim = x2d.shape[1]
    in_pad = w1_t.shape[0]
    out_pad = w3_t.shape[1]

    tile_b, b_pad = _choose_tiling(B)

    # jnp.pad on the bf16-cast activations (fuses better than zeros+scatter);
    # fast path skips the pad entirely when shapes are already aligned.
    x_bf = x2d.astype(jnp.bfloat16)
    if b_pad != B or in_pad != in_dim:
        x_p = jnp.pad(x_bf, ((0, b_pad - B), (0, in_pad - in_dim)))
    else:
        x_p = x_bf

    # TODO(synk): K-tile layer 1 over in_pad (f32 VMEM accumulator + pl.when
    # init/finalize) when the flattened input dim is large enough that a
    # VMEM-resident W1 would exceed the v7x 64 MiB budget.

    def resident(shape):
        # Grid-invariant operands: single-buffer to halve their VMEM footprint.
        if use_buffered:
            return pl.BlockSpec(shape, lambda i: (0, 0),
                                pipeline_mode=pl.Buffered(1))
        return pl.BlockSpec(shape, lambda i: (0, 0))

    grid = (b_pad // tile_b,)

    out_padded = pl.pallas_call(
        mlp_kernel,
        out_shape=jax.ShapeDtypeStruct((b_pad, out_pad), out_dtype),
        grid=grid,
        in_specs=[
            pl.BlockSpec((tile_b, in_pad), lambda i: (i, 0)),   # x tile
            resident(w1_t.shape), resident(b1_r.shape),
            resident(w2_t.shape), resident(b2_r.shape),
            resident(w3_t.shape), resident(b3_r.shape),
        ],
        out_specs=pl.BlockSpec((tile_b, out_pad), lambda i: (i, 0)),
        compiler_params=pltpu.CompilerParams(
            dimension_semantics=("parallel",),
            vmem_limit_bytes=_vmem_limit_bytes(),
        ),
    )(x_p, w1_t, b1_r, w2_t, b2_r, w3_t, b3_r)

    # Slice away batch padding and padded (zero-bias) output columns.
    return out_padded[:B, :out_dim]


def mlp_forward(x, prepared, out_dim, out_dtype=jnp.float32):
    """Forward pass matching MLPModel.forward. Uses single-buffered resident
    weights when supported; caches a fallback decision otherwise."""
    global _BUFFERED_OK
    if _BUFFERED_OK is None:
        if _HAS_BUFFERED:
            try:
                out = _mlp_forward_impl(x, prepared, out_dim=out_dim,
                                        out_dtype=out_dtype, use_buffered=True)
                jax.block_until_ready(out)
                _BUFFERED_OK = True
                return out
            except Exception:
                _BUFFERED_OK = False
        else:
            _BUFFERED_OK = False
    return _mlp_forward_impl(x, prepared, out_dim=out_dim,
                             out_dtype=out_dtype, use_buffered=_BUFFERED_OK)


# ----------------------------------------------------------------------------
# Deterministic init mimicking nn.Linear (uniform +/- 1/sqrt(fan_in)).
# ----------------------------------------------------------------------------
def init_params(key, input_dim, hidden1_dim, hidden2_dim, output_dim):
    keys = jax.random.split(key, 6)

    def linear(kw, kb, fan_in, fan_out):
        bound = 1.0 / jnp.sqrt(fan_in)
        w = jax.random.uniform(kw, (fan_out, fan_in), jnp.float32, -bound, bound)
        b = jax.random.uniform(kb, (fan_out,), jnp.float32, -bound, bound)
        return w, b

    w1, b1 = linear(keys[0], keys[1], input_dim, hidden1_dim)
    w2, b2 = linear(keys[2], keys[3], hidden1_dim, hidden2_dim)
    w3, b3 = linear(keys[4], keys[5], hidden2_dim, output_dim)
    return w1, b1, w2, b2, w3, b3


if __name__ == "__main__":
    key = jax.random.PRNGKey(0)
    k_x, k_p = jax.random.split(key)

    # Small shapes: input (B=2, C=4, H=4, W=4) -> flattened input_dim = 64.
    B, C, H, W = 2, 4, 4, 4
    input_dim = C * H * W          # 64
    hidden1_dim = 32
    hidden2_dim = 32
    output_dim = 16

    x = jax.random.normal(k_x, (B, C, H, W), jnp.float32)
    w1, b1, w2, b2, w3, b3 = init_params(
        k_p, input_dim, hidden1_dim, hidden2_dim, output_dim)

    prepared, out_dim = prepare_params(w1, b1, w2, b2, w3, b3)

    out = mlp_forward(x, prepared, out_dim)
    jax.block_until_ready(out)

    # Pure-JAX reference with matching precision (bf16 operands, f32 accumulate).
    xf = x.reshape(B, -1)
    def bdot(a, w):
        return jnp.dot(a.astype(jnp.bfloat16), w.T.astype(jnp.bfloat16),
                       preferred_element_type=jnp.float32)
    ref = jnp.maximum(bdot(xf, w1) + b1, 0.0)
    ref = jnp.maximum(bdot(ref, w2) + b2, 0.0)
    ref = bdot(ref, w3) + b3

    # Full-f32 reference as a loose sanity check on bf16 error.
    ref32 = jnp.maximum(xf @ w1.T + b1, 0.0)
    ref32 = jnp.maximum(ref32 @ w2.T + b2, 0.0)
    ref32 = ref32 @ w3.T + b3

    assert out.shape == (B, output_dim)
    assert out.dtype == jnp.float32
    assert jnp.allclose(out, ref, atol=1e-2, rtol=1e-2)
    assert jnp.allclose(out, ref32, atol=5e-2, rtol=5e-2)

    print("KERNEL_OK")
</pallas_src>

<mosaic_0001>
module attributes {stable_mosaic.version = 11 : i64} {
  func.func @mlp_kernel(%arg0: i32, %arg1: memref<8x128xbf16, #tpu.memory_space<vmem>>, %arg2: memref<128x128xbf16, #tpu.memory_space<vmem>>, %arg3: memref<1x128xf32, #tpu.memory_space<vmem>>, %arg4: memref<128x128xbf16, #tpu.memory_space<vmem>>, %arg5: memref<1x128xf32, #tpu.memory_space<vmem>>, %arg6: memref<128x128xbf16, #tpu.memory_space<vmem>>, %arg7: memref<1x128xf32, #tpu.memory_space<vmem>>, %arg8: memref<8x128xf32, #tpu.memory_space<vmem>>) attributes {dimension_semantics = [#tpu.dimension_semantics<parallel>], iteration_bounds = array<i64: 1>, scalar_prefetch = 0 : i64, scratch_operands = 0 : i64, tpu.core_type = #tpu.core_type<tc>, window_params = [{transform_indices = @transform_0, window_bounds = array<i64: 8, 128>}, {pipeline_mode = #tpu.pipeline_mode<synchronous>, transform_indices = @transform_1, window_bounds = array<i64: 128, 128>}, {pipeline_mode = #tpu.pipeline_mode<synchronous>, transform_indices = @transform_2, window_bounds = array<i64: 1, 128>}, {pipeline_mode = #tpu.pipeline_mode<synchronous>, transform_indices = @transform_3, window_bounds = array<i64: 128, 128>}, {pipeline_mode = #tpu.pipeline_mode<synchronous>, transform_indices = @transform_4, window_bounds = array<i64: 1, 128>}, {pipeline_mode = #tpu.pipeline_mode<synchronous>, transform_indices = @transform_5, window_bounds = array<i64: 128, 128>}, {pipeline_mode = #tpu.pipeline_mode<synchronous>, transform_indices = @transform_6, window_bounds = array<i64: 1, 128>}, {transform_indices = @transform_7, window_bounds = array<i64: 8, 128>}]} {
    %c0 = arith.constant 0 : index
    %c0_0 = arith.constant 0 : index
    %0 = vector.load %arg1[%c0, %c0_0] : memref<8x128xbf16, #tpu.memory_space<vmem>>, vector<8x128xbf16>
    %c0_1 = arith.constant 0 : index
    %c0_2 = arith.constant 0 : index
    %1 = vector.load %arg2[%c0_1, %c0_2] : memref<128x128xbf16, #tpu.memory_space<vmem>>, vector<128x128xbf16>
    %cst = arith.constant dense<0.000000e+00> : vector<8x128xf32>
    %2 = tpu.matmul %0, %1, %cst {dimension_numbers = #tpu.dot_dimension_numbers<[1], [0], [0], [1], [0, 0, 1, 1], [], []>} : vector<8x128xbf16>, vector<128x128xbf16>, vector<8x128xf32> -> vector<8x128xf32>
    %c0_3 = arith.constant 0 : index
    %c0_4 = arith.constant 0 : index
    %3 = vector.load %arg3[%c0_3, %c0_4] : memref<1x128xf32, #tpu.memory_space<vmem>>, vector<1x128xf32>
    %4 = vector.broadcast %3 : vector<1x128xf32> to vector<8x128xf32>
    %5 = arith.addf %2, %4 : vector<8x128xf32>
    %cst_5 = arith.constant 0.000000e+00 : f32
    %6 = vector.broadcast %cst_5 : f32 to vector<8x128xf32>
    %7 = arith.maximumf %5, %6 : vector<8x128xf32>
    %8 = arith.truncf %7 : vector<8x128xf32> to vector<8x128xbf16>
    %c0_6 = arith.constant 0 : index
    %c0_7 = arith.constant 0 : index
    %9 = vector.load %arg4[%c0_6, %c0_7] : memref<128x128xbf16, #tpu.memory_space<vmem>>, vector<128x128xbf16>
    %cst_8 = arith.constant dense<0.000000e+00> : vector<8x128xf32>
    %10 = tpu.matmul %8, %9, %cst_8 {dimension_numbers = #tpu.dot_dimension_numbers<[1], [0], [0], [1], [0, 0, 1, 1], [], []>} : vector<8x128xbf16>, vector<128x128xbf16>, vector<8x128xf32> -> vector<8x128xf32>
    %c0_9 = arith.constant 0 : index
    %c0_10 = arith.constant 0 : index
    %11 = vector.load %arg5[%c0_9, %c0_10] : memref<1x128xf32, #tpu.memory_space<vmem>>, vector<1x128xf32>
    %12 = vector.broadcast %11 : vector<1x128xf32> to vector<8x128xf32>
    %13 = arith.addf %10, %12 : vector<8x128xf32>
    %cst_11 = arith.constant 0.000000e+00 : f32
    %14 = vector.broadcast %cst_11 : f32 to vector<8x128xf32>
    %15 = arith.maximumf %13, %14 : vector<8x128xf32>
    %16 = arith.truncf %15 : vector<8x128xf32> to vector<8x128xbf16>
    %c0_12 = arith.constant 0 : index
    %c0_13 = arith.constant 0 : index
    %17 = vector.load %arg6[%c0_12, %c0_13] : memref<128x128xbf16, #tpu.memory_space<vmem>>, vector<128x128xbf16>
    %cst_14 = arith.constant dense<0.000000e+00> : vector<8x128xf32>
    %18 = tpu.matmul %16, %17, %cst_14 {dimension_numbers = #tpu.dot_dimension_numbers<[1], [0], [0], [1], [0, 0, 1, 1], [], []>} : vector<8x128xbf16>, vector<128x128xbf16>, vector<8x128xf32> -> vector<8x128xf32>
    %c0_15 = arith.constant 0 : index
    %c0_16 = arith.constant 0 : index
    %19 = vector.load %arg7[%c0_15, %c0_16] : memref<1x128xf32, #tpu.memory_space<vmem>>, vector<1x128xf32>
    %20 = vector.broadcast %19 : vector<1x128xf32> to vector<8x128xf32>
    %21 = arith.addf %18, %20 : vector<8x128xf32>
    %c0_17 = arith.constant 0 : index
    %c0_18 = arith.constant 0 : index
    %22 = vector.load %arg8[%c0_17, %c0_18] : memref<8x128xf32, #tpu.memory_space<vmem>>, vector<8x128xf32>
    tpu.vector_store %arg8[%c0_17, %c0_18], %21 {strides = array<i32>} : memref<8x128xf32, #tpu.memory_space<vmem>>, vector<8x128xf32>,
    return
  }
  func.func @transform_0(%arg0: i32) -> (i32, i32) {
    %c0_i32 = arith.constant 0 : i32
    %c0_i32_0 = arith.constant 0 : i32
    return %arg0, %c0_i32 : i32, i32
  }
  func.func @transform_1(%arg0: i32) -> (i32, i32) {
    %c0_i32 = arith.constant 0 : i32
    %c0_i32_0 = arith.constant 0 : i32
    %c0_i32_1 = arith.constant 0 : i32
    return %c0_i32, %c0_i32_0 : i32, i32
  }
  func.func @transform_2(%arg0: i32) -> (i32, i32) {
    %c0_i32 = arith.constant 0 : i32
    %c0_i32_0 = arith.constant 0 : i32
    %c0_i32_1 = arith.constant 0 : i32
    return %c0_i32, %c0_i32_0 : i32, i32
  }
  func.func @transform_3(%arg0: i32) -> (i32, i32) {
    %c0_i32 = arith.constant 0 : i32
    %c0_i32_0 = arith.constant 0 : i32
    %c0_i32_1 = arith.constant 0 : i32
    return %c0_i32, %c0_i32_0 : i32, i32
  }
  func.func @transform_4(%arg0: i32) -> (i32, i32) {
    %c0_i32 = arith.constant 0 : i32
    %c0_i32_0 = arith.constant 0 : i32
    %c0_i32_1 = arith.constant 0 : i32
    return %c0_i32, %c0_i32_0 : i32, i32
  }
  func.func @transform_5(%arg0: i32) -> (i32, i32) {
    %c0_i32 = arith.constant 0 : i32
    %c0_i32_0 = arith.constant 0 : i32
    %c0_i32_1 = arith.constant 0 : i32
    return %c0_i32, %c0_i32_0 : i32, i32
  }
  func.func @transform_6(%arg0: i32) -> (i32, i32) {
    %c0_i32 = arith.constant 0 : i32
    %c0_i32_0 = arith.constant 0 : i32
    %c0_i32_1 = arith.constant 0 : i32
    return %c0_i32, %c0_i32_0 : i32, i32
  }
  func.func @transform_7(%arg0: i32) -> (i32, i32) {
    %c0_i32 = arith.constant 0 : i32
    %c0_i32_0 = arith.constant 0 : i32
    return %arg0, %c0_i32 : i32, i32
  }
}

module attributes {stable_mosaic.version = 11 : i64} {
  func.func @mlp_kernel(%arg0: i32, %arg1: memref<8x128xbf16, #tpu.memory_space<vmem>>, %arg2: memref<128x128xbf16, #tpu.memory_space<vmem>>, %arg3: memref<1x128xf32, #tpu.memory_space<vmem>>, %arg4: memref<128x128xbf16, #tpu.memory_space<vmem>>, %arg5: memref<1x128xf32, #tpu.memory_space<vmem>>, %arg6: memref<128x128xbf16, #tpu.memory_space<vmem>>, %arg7: memref<1x128xf32, #tpu.memory_space<vmem>>, %arg8: memref<8x128xf32, #tpu.memory_space<vmem>>) attributes {dimension_semantics = [#tpu.dimension_semantics<parallel>], iteration_bounds = array<i64: 1>, scalar_prefetch = 0 : i64, scratch_operands = 0 : i64, tpu.core_type = #tpu.core_type<tc>, window_params = [{transform_indices = @transform_0, window_bounds = array<i64: 8, 128>}, {pipeline_mode = #tpu.pipeline_mode<synchronous>, transform_indices = @transform_1, window_bounds = array<i64: 128, 128>}, {pipeline_mode = #tpu.pipeline_mode<synchronous>, transform_indices = @transform_2, window_bounds = array<i64: 1, 128>}, {pipeline_mode = #tpu.pipeline_mode<synchronous>, transform_indices = @transform_3, window_bounds = array<i64: 128, 128>}, {pipeline_mode = #tpu.pipeline_mode<synchronous>, transform_indices = @transform_4, window_bounds = array<i64: 1, 128>}, {pipeline_mode = #tpu.pipeline_mode<synchronous>, transform_indices = @transform_5, window_bounds = array<i64: 128, 128>}, {pipeline_mode = #tpu.pipeline_mode<synchronous>, transform_indices = @transform_6, window_bounds = array<i64: 1, 128>}, {transform_indices = @transform_7, window_bounds = array<i64: 8, 128>}]} {
    %c0 = arith.constant 0 : index
    %c0_0 = arith.constant 0 : index
    %0 = vector.load %arg1[%c0, %c0_0] : memref<8x128xbf16, #tpu.memory_space<vmem>>, vector<8x128xbf16>
    %c0_1 = arith.constant 0 : index
    %c0_2 = arith.constant 0 : index
    %1 = vector.load %arg2[%c0_1, %c0_2] : memref<128x128xbf16, #tpu.memory_space<vmem>>, vector<128x128xbf16>
    %cst = arith.constant dense<0.000000e+00> : vector<8x128xf32>
    %2 = tpu.matmul %0, %1, %cst {dimension_numbers = #tpu.dot_dimension_numbers<[1], [0], [0], [1], [0, 0, 1, 1], [], []>} : vector<8x128xbf16>, vector<128x128xbf16>, vector<8x128xf32> -> vector<8x128xf32>
    %c0_3 = arith.constant 0 : index
    %c0_4 = arith.constant 0 : index
    %3 = vector.load %arg3[%c0_3, %c0_4] : memref<1x128xf32, #tpu.memory_space<vmem>>, vector<1x128xf32>
    %4 = vector.broadcast %3 : vector<1x128xf32> to vector<8x128xf32>
    %5 = arith.addf %2, %4 : vector<8x128xf32>
    %cst_5 = arith.constant 0.000000e+00 : f32
    %6 = vector.broadcast %cst_5 : f32 to vector<8x128xf32>
    %7 = arith.maximumf %5, %6 : vector<8x128xf32>
    %8 = arith.truncf %7 : vector<8x128xf32> to vector<8x128xbf16>
    %c0_6 = arith.constant 0 : index
    %c0_7 = arith.constant 0 : index
    %9 = vector.load %arg4[%c0_6, %c0_7] : memref<128x128xbf16, #tpu.memory_space<vmem>>, vector<128x128xbf16>
    %cst_8 = arith.constant dense<0.000000e+00> : vector<8x128xf32>
    %10 = tpu.matmul %8, %9, %cst_8 {dimension_numbers = #tpu.dot_dimension_numbers<[1], [0], [0], [1], [0, 0, 1, 1], [], []>} : vector<8x128xbf16>, vector<128x128xbf16>, vector<8x128xf32> -> vector<8x128xf32>
    %c0_9 = arith.constant 0 : index
    %c0_10 = arith.constant 0 : index
    %11 = vector.load %arg5[%c0_9, %c0_10] : memref<1x128xf32, #tpu.memory_space<vmem>>, vector<1x128xf32>
    %12 = vector.broadcast %11 : vector<1x128xf32> to vector<8x128xf32>
    %13 = arith.addf %10, %12 : vector<8x128xf32>
    %cst_11 = arith.constant 0.000000e+00 : f32
    %14 = vector.broadcast %cst_11 : f32 to vector<8x128xf32>
    %15 = arith.maximumf %13, %14 : vector<8x128xf32>
    %16 = arith.truncf %15 : vector<8x128xf32> to vector<8x128xbf16>
    %c0_12 = arith.constant 0 : index
    %c0_13 = arith.constant 0 : index
    %17 = vector.load %arg6[%c0_12, %c0_13] : memref<128x128xbf16, #tpu.memory_space<vmem>>, vector<128x128xbf16>
    %cst_14 = arith.constant dense<0.000000e+00> : vector<8x128xf32>
    %18 = tpu.matmul %16, %17, %cst_14 {dimension_numbers = #tpu.dot_dimension_numbers<[1], [0], [0], [1], [0, 0, 1, 1], [], []>} : vector<8x128xbf16>, vector<128x128xbf16>, vector<8x128xf32> -> vector<8x128xf32>
    %c0_15 = arith.constant 0 : index
    %c0_16 = arith.constant 0 : index
    %19 = vector.load %arg7[%c0_15, %c0_16] : memref<1x128xf32, #tpu.memory_space<vmem>>, vector<1x128xf32>
    %20 = vector.broadcast %19 : vector<1x128xf32> to vector<8x128xf32>
    %21 = arith.addf %18, %20 : vector<8x128xf32>
    %c0_17 = arith.constant 0 : index
    %c0_18 = arith.constant 0 : index
    %22 = vector.load %arg8[%c0_17, %c0_18] : memref<8x128xf32, #tpu.memory_space<vmem>>, vector<8x128xf32>
    tpu.vector_store %arg8[%c0_17, %c0_18], %21 {strides = array<i32>} : memref<8x128xf32, #tpu.memory_space<vmem>>, vector<8x128xf32>,
    return
  }
  func.func @transform_0(%arg0: i32) -> (i32, i32) {
    %c0_i32 = arith.constant 0 : i32
    %c0_i32_0 = arith.constant 0 : i32
    return %arg0, %c0_i32 : i32, i32
  }
  func.func @transform_1(%arg0: i32) -> (i32, i32) {
    %c0_i32 = arith.constant 0 : i32
    %c0_i32_0 = arith.constant 0 : i32
    %c0_i32_1 = arith.constant 0 : i32
    return %c0_i32, %c0_i32_0 : i32, i32
  }
  func.func @transform_2(%arg0: i32) -> (i32, i32) {
    %c0_i32 = arith.constant 0 : i32
    %c0_i32_0 = arith.constant 0 : i32
    %c0_i32_1 = arith.constant 0 : i32
    return %c0_i32, %c0_i32_0 : i32, i32
  }
  func.func @transform_3(%arg0: i32) -> (i32, i32) {
    %c0_i32 = arith.constant 0 : i32
    %c0_i32_0 = arith.constant 0 : i32
    %c0_i32_1 = arith.constant 0 : i32
    return %c0_i32, %c0_i32_0 : i32, i32
  }
  func.func @transform_4(%arg0: i32) -> (i32, i32) {
    %c0_i32 = arith.constant 0 : i32
    %c0_i32_0 = arith.constant 0 : i32
    %c0_i32_1 = arith.constant 0 : i32
    return %c0_i32, %c0_i32_0 : i32, i32
  }
  func.func @transform_5(%arg0: i32) -> (i32, i32) {
    %c0_i32 = arith.constant 0 : i32
    %c0_i32_0 = arith.constant 0 : i32
    %c0_i32_1 = arith.constant 0 : i32
    return %c0_i32, %c0_i32_0 : i32, i32
  }
  func.func @transform_6(%arg0: i32) -> (i32, i32) {
    %c0_i32 = arith.constant 0 : i32
    %c0_i32_0 = arith.constant 0 : i32
    %c0_i32_1 = arith.constant 0 : i32
    return %c0_i32, %c0_i32_0 : i32, i32
  }
  func.func @transform_7(%arg0: i32) -> (i32, i32) {
    %c0_i32 = arith.constant 0 : i32
    %c0_i32_0 = arith.constant 0 : i32
    return %arg0, %c0_i32 : i32, i32
  }
}

</mosaic_0001>

<bundles_post_ra>
// kernel: _mlp_forward_impl.1
= control target key start
LH: loop header
LB: loop body
LE: loop exit
PB: predicated region body
PF: predicated region fallthrough
CT: control target
= control target key end

     0   :  { %12 = vsyncpa [#allocation3], 0  ;;  %s731_s0 = inlined_call_operand.vmem [shape: bf16[8,128], index: 0, kind: input, shape index: {}]   ;;  %s732_s1 = inlined_call_operand.vmem [shape: bf16[128,128], index: 1, kind: input, shape index: {}]   ;;  %s733_s2 = inlined_call_operand.vmem [shape: f32[1,128], index: 2, kind: input, shape index: {}]   ;;  %s734_s3 = inlined_call_operand.hbm [shape: bf16[128,128], index: 3, kind: input, shape index: {}]   ;;  %s735_s4 = inlined_call_operand.vmem [shape: f32[1,128], index: 4, kind: input, shape index: {}]   ;;  %s736_s5 = inlined_call_operand.hbm [shape: bf16[128,128], index: 5, kind: input, shape index: {}]   ;;  %s737_s6 = inlined_call_operand.vmem [shape: f32[1,128], index: 6, kind: input, shape index: {}]   ;;  %s738_s7 = inlined_call_operand.vmem [shape: f32[8,128], index: 7, kind: output, shape index: {}]  }
   0x1   :  { %13 = vsyncpa [#allocation5], 0  ;;  %s592_s24 = smov [#allocation2]   ;;  %s544_s28 = scalar_lea.hbm %s734_s3, 1024 }
   0x2   :  { %s25_s25 = sshll.u32 %s592_s24, 4  ;;  %p545_p0 = scmp.ne.s32.totalorder %s734_s3, %s544_s28  ;;  %s26_s25 = int_to_ptr.vmem [resolvable:$true] %s25_s25 }
   0x3   :  { %p548_p1 = scmp.lt.u32.totalorder %s544_s28, %s734_s3 }
   0x5   :  { %p550_p2 = pnand %p548_p1, %p545_p0 }
   0x7   :  { %553 = shalt.err (!%p550_p2)
}
   0x8   :  { %s554_s10 = scalar_lea.vmem %s26_s25, 1024  ;;  %p559_p4 = scmp.lt.s32.totalorder %s26_s25, %s26_s25 }
   0x9   :  { %p555_p3 = scmp.ne.s32.totalorder %s26_s25, %s554_s10  ;;  %p560_p5 = scmp.lt.s32.totalorder %s554_s10, %s554_s10 }
   0xb   :  { %p561_p6 = por %p560_p5, %p559_p4 }
   0xd   :  { %p562_p7 = pnand %p561_p6, %p555_p3 }
   0xf   :  { %565 = shalt.err (!%p562_p7)
}
  0x10   :  { %s593_s11 = smov 64   ;;  %s594_s12 = smov 4  }
  0x11   :  { %31 = dma.hbm_to_vmem [thread:$0]  %s734_s3, 1024, %s26_s25, [#allocation3], %s593_s11, %s593_s11, %s594_s12  }
  0x12   :  { %s595_s15 = smov [#allocation4]   ;;  %s566_s19 = scalar_lea.hbm %s736_s5, 1024 }
  0x13   :  { %s39_s16 = sshll.u32 %s595_s15, 4  ;;  %p567_p8 = scmp.ne.s32.totalorder %s736_s5, %s566_s19  ;;  %s40_s16 = int_to_ptr.vmem [resolvable:$true] %s39_s16 }
  0x14   :  { %p570_p9 = scmp.lt.u32.totalorder %s566_s19, %s736_s5 }
  0x16   :  { %p572_p10 = pnand %p570_p9, %p567_p8 }
  0x18   :  { %575 = shalt.err (!%p572_p10)
}
  0x19   :  { %s576_s24 = scalar_lea.vmem %s40_s16, 1024  ;;  %p581_p12 = scmp.lt.s32.totalorder %s40_s16, %s40_s16 }
  0x1a   :  { %p577_p11 = scmp.ne.s32.totalorder %s40_s16, %s576_s24  ;;  %p582_p13 = scmp.lt.s32.totalorder %s576_s24, %s576_s24 }
  0x1c   :  { %p583_p0 = por %p582_p13, %p581_p12 }
  0x1e   :  { %p584_p1 = pnand %p583_p0, %p577_p11 }
  0x20   :  { %587 = shalt.err (!%p584_p1)
}
  0x21   :  { %45 = dma.hbm_to_vmem [thread:$0]  %s736_s5, 1024, %s40_s16, [#allocation5], %s593_s11, %s593_s11, %s594_s12  }
  0x22   :  { %588 = dma.done.wait [#allocation3], 1024  }
  0x23   :  { %589 = vsyncadd [#allocation3], 4294966272 }
  0x24   :  { %590 = dma.done.wait [#allocation5], 1024  }
  0x25   :  { %591 = vsyncadd [#allocation5], 4294966272  ;;  %v596_v0 = vmov 0.0   ;;  %vm597_vm0 = vmmov 0   ;;  %v520_v1 = vld [vmem:[%s732_s1] sm:$0xff]   ;;  %v521_v2 = vld [vmem:[%s732_s1 + $0x8] sm:$0xff]  }
  0x26   :  { %454 = vmatprep.subr.bf16.mxu0 %v596_v0  ;;  %470 = vmatprep.mubr.msk.bf16.mxu0 %vm597_vm0, %v596_v0  ;;  %v522_v3 = vld [vmem:[%s732_s1 + $0x10] sm:$0xff]   ;;  %v528_v4 = vld [vmem:[#allocation2] sm:$0xff]   ;;  %v523_v5 = vld [vmem:[%s732_s1 + $0x18] sm:$0xff]  }
  0x27   :  { %474 = vmatprep.subr.bf16.mxu1 %v596_v0  ;;  %490 = vmatprep.mubr.msk.bf16.mxu1 %vm597_vm0, %v596_v0  ;;  %v529_v6 = vld [vmem:[#allocation2 + $0x8] sm:$0xff]   ;;  %v524_v7 = vld [vmem:[%s732_s1 + $0x20] sm:$0xff]   ;;  %v530_v8 = vld [vmem:[#allocation2 + $0x10] sm:$0xff]  }
  0x28   :  { %455 = vmatpush3.bf16.msra.mxu0 %v520_v1  ;;  %475 = vmatpush3.bf16.msra.mxu1 %v528_v4  ;;  %v525_v9 = vld [vmem:[%s732_s1 + $0x28] sm:$0xff]   ;;  %v531_v10 = vld [vmem:[#allocation2 + $0x18] sm:$0xff]   ;;  %v526_v11 = vld [vmem:[%s732_s1 + $0x30] sm:$0xff]  }
  0x29   :  { %456 = vmatprep.subr.bf16.mxu0 %v596_v0  ;;  %476 = vmatprep.subr.bf16.mxu1 %v596_v0  ;;  %v532_v12 = vld [vmem:[#allocation2 + $0x20] sm:$0xff]   ;;  %v527_v13 = vld [vmem:[%s732_s1 + $0x38] sm:$0xff]   ;;  %v533_v14 = vld [vmem:[#allocation2 + $0x28] sm:$0xff]  }
  0x2a   :  { %v55_v15 = vld [vmem:[%s731_s0] sm:$0xf]  ;;  %v534_v16 = vld [vmem:[#allocation2 + $0x30] sm:$0xff]   ;;  %v535_v17 = vld [vmem:[#allocation2 + $0x38] sm:$0xff]  }
  0x2b   :  { %v536_v18 = vld [vmem:[#allocation4] sm:$0xff]   ;;  %v537_v19 = vld [vmem:[#allocation4 + $0x8] sm:$0xff]   ;;  %v538_v20 = vld [vmem:[#allocation4 + $0x10] sm:$0xff]  }
  0x2c   :  { %457 = vmatpush3.bf16.msra.mxu0 %v521_v2  ;;  %477 = vmatpush3.bf16.msra.mxu1 %v529_v6  ;;  %v539_v21 = vld [vmem:[#allocation4 + $0x18] sm:$0xff]   ;;  %v540_v22 = vld [vmem:[#allocation4 + $0x20] sm:$0xff]   ;;  %v541_v23 = vld [vmem:[#allocation4 + $0x28] sm:$0xff]  }
  0x2d   :  { %458 = vmatprep.subr.bf16.mxu0 %v596_v0  ;;  %478 = vmatprep.subr.bf16.mxu1 %v596_v0  ;;  %v400_v24 = vld [vmem:[%s733_s2] ss:$0 sm:$0xff]  ;;  %v542_v32 = vld [vmem:[#allocation4 + $0x30] sm:$0xff]   ;;  %v543_v33 = vld [vmem:[#allocation4 + $0x38] sm:$0xff]  }
  0x2e   :  { %v409_v34 = vld [vmem:[%s735_s4] ss:$0 sm:$0xff] }
  0x2f   :  { %v418_v42 = vld [vmem:[%s737_s6] ss:$0 sm:$0xff] }
  0x30   :  { %459 = vmatpush3.bf16.msra.mxu0 %v522_v3  ;;  %479 = vmatpush3.bf16.msra.mxu1 %v530_v8 }
  0x31   :  { %460 = vmatprep.subr.bf16.mxu0 %v596_v0  ;;  %480 = vmatprep.subr.bf16.mxu1 %v596_v0 }
  0x34   :  { %461 = vmatpush3.bf16.msra.mxu0 %v523_v5  ;;  %481 = vmatpush3.bf16.msra.mxu1 %v531_v10 }
  0x35   :  { %462 = vmatprep.subr.bf16.mxu0 %v596_v0  ;;  %482 = vmatprep.subr.bf16.mxu1 %v596_v0 }
  0x38   :  { %463 = vmatpush3.bf16.msra.mxu0 %v524_v7  ;;  %483 = vmatpush3.bf16.msra.mxu1 %v532_v12 }
  0x39   :  { %464 = vmatprep.subr.bf16.mxu0 %v596_v0  ;;  %484 = vmatprep.subr.bf16.mxu1 %v596_v0 }
  0x3c   :  { %465 = vmatpush3.bf16.msra.mxu0 %v525_v9  ;;  %485 = vmatpush3.bf16.msra.mxu1 %v533_v14 }
  0x3d   :  { %466 = vmatprep.subr.bf16.mxu0 %v596_v0  ;;  %486 = vmatprep.subr.bf16.mxu1 %v596_v0 }
  0x40   :  { %467 = vmatpush3.bf16.msra.mxu0 %v526_v11  ;;  %487 = vmatpush3.bf16.msra.mxu1 %v534_v16 }
  0x41   :  { %468 = vmatprep.subr.bf16.mxu0 %v596_v0  ;;  %488 = vmatprep.subr.bf16.mxu1 %v596_v0 }
  0x44   :  { %469 = vmatpush3.bf16.msra.mxu0 %v527_v13  ;;  %489 = vmatpush3.bf16.msra.mxu1 %v535_v17 }
  0x45   :  { %494 = vmatprep.subr.bf16.mxu0 %v596_v0 }
  0x47   :  { %471 = vmatmul.mubr.bf16.vlgmr.msra.gmra.mrb[0].mxu0 %v55_v15 }
  0x48   :  { %510 = vmatprep.mubr.msk.bf16.mxu0 %vm597_vm0, %v596_v0  ;;  %495 = vmatpush3.bf16.msra.mxu0 %v536_v18 }
  0x49   :  { %496 = vmatprep.subr.bf16.mxu0 %v596_v0 }
  0x4c   :  { %497 = vmatpush3.bf16.msra.mxu0 %v537_v19 }
  0x4d   :  { %498 = vmatprep.subr.bf16.mxu0 %v596_v0 }
  0x50   :  { %499 = vmatpush3.bf16.msra.mxu0 %v538_v20 }
  0x51   :  { %500 = vmatprep.subr.bf16.mxu0 %v596_v0 }
  0x54   :  { %501 = vmatpush3.bf16.msra.mxu0 %v539_v21 }
  0x55   :  { %502 = vmatprep.subr.bf16.mxu0 %v596_v0 }
  0x58   :  { %503 = vmatpush3.bf16.msra.mxu0 %v540_v22 }
  0x59   :  { %504 = vmatprep.subr.bf16.mxu0 %v596_v0 }
  0x5c   :  { %505 = vmatpush3.bf16.msra.mxu0 %v541_v23 }
  0x5d   :  { %506 = vmatprep.subr.bf16.mxu0 %v596_v0 }
  0x60   :  { %507 = vmatpush3.bf16.msra.mxu0 %v542_v32 }
  0x61   :  { %508 = vmatprep.subr.bf16.mxu0 %v596_v0 }
  0x64   :  { %509 = vmatpush3.bf16.msra.mxu0 %v543_v33 }
 0x11a   :  { %v161_v25 = vpop.f32.mrb[0].mxu0 }
 0x11b   :  { %v162_v26 = vadd.f32 %v400_v24, %v161_v25  ;;  %v472_v27 = vpop.f32.mrb[1].mxu0 }
 0x11c   :  { %v164_v28 = vpop.f32.mrb[2].mxu0 }
 0x11d   :  { %v167_v29 = vmax.f32 %v162_v26, 0.0  ;;  %v473_v30 = vpop.f32.mrb[3].mxu0 }
 0x11f   :  { %v168_v31 = vpack.c.bf16 %v167_v29, %v167_v29 }
 0x121   :  { %491 = vmatmul.mubr.bf16.vlgmr.msra.gmra.mrb[0].mxu1 %v168_v31 }
 0x1f4   :  { %v274_v35 = vpop.f32.mrb[0].mxu1 }
 0x1f5   :  { %v275_v36 = vadd.f32 %v409_v34, %v274_v35  ;;  %v492_v37 = vpop.f32.mrb[1].mxu1 }
 0x1f6   :  { %v277_v38 = vpop.f32.mrb[2].mxu1 }
 0x1f7   :  { %v280_v39 = vmax.f32 %v275_v36, 0.0  ;;  %v493_v40 = vpop.f32.mrb[3].mxu1 }
 0x1f9   :  { %v281_v41 = vpack.c.bf16 %v280_v39, %v280_v39 }
 0x1fb   :  { %511 = vmatmul.mubr.bf16.vlgmr.msra.gmra.mrb[4].mxu0 %v281_v41 }
 0x2ce   :  { %v387_v43 = vpop.f32.mrb[4].mxu0 }
 0x2cf   :  { %v388_v44 = vadd.f32 %v418_v42, %v387_v43  ;;  %v512_v45 = vpop.f32.mrb[5].mxu0 }
 0x2d0   :  { %v390_v46 = vpop.f32.mrb[6].mxu0 }
 0x2d1   :  { %393 = vst [vmem:[%s738_s7] sm:$0xff] %v388_v44  ;;  %v513_v47 = vpop.f32.mrb[7].mxu0 }
 0x2d2   :  { %398 = vsyncpa [#allocation3], 1 }
 0x2d3   :  { %399 = vsyncpa [#allocation5], 1 }

// kernel: _mlp_forward_impl.1
= control target key start
LH: loop header
LB: loop body
LE: loop exit
PB: predicated region body
PF: predicated region fallthrough
CT: control target
= control target key end

     0   :  { %12 = vsyncpa [#allocation3], 0  ;;  %s731_s0 = inlined_call_operand.vmem [shape: bf16[8,128], index: 0, kind: input, shape index: {}]   ;;  %s732_s1 = inlined_call_operand.vmem [shape: bf16[128,128], index: 1, kind: input, shape index: {}]   ;;  %s733_s2 = inlined_call_operand.vmem [shape: f32[1,128], index: 2, kind: input, shape index: {}]   ;;  %s734_s3 = inlined_call_operand.hbm [shape: bf16[128,128], index: 3, kind: input, shape index: {}]   ;;  %s735_s4 = inlined_call_operand.vmem [shape: f32[1,128], index: 4, kind: input, shape index: {}]   ;;  %s736_s5 = inlined_call_operand.hbm [shape: bf16[128,128], index: 5, kind: input, shape index: {}]   ;;  %s737_s6 = inlined_call_operand.vmem [shape: f32[1,128], index: 6, kind: input, shape index: {}]   ;;  %s738_s7 = inlined_call_operand.vmem [shape: f32[8,128], index: 7, kind: output, shape index: {}]  }
   0x1   :  { %13 = vsyncpa [#allocation5], 0  ;;  %s592_s24 = smov [#allocation2]   ;;  %s544_s28 = scalar_lea.hbm %s734_s3, 1024 }
   0x2   :  { %s25_s25 = sshll.u32 %s592_s24, 4  ;;  %p545_p0 = scmp.ne.s32.totalorder %s734_s3, %s544_s28  ;;  %s26_s25 = int_to_ptr.vmem [resolvable:$true] %s25_s25 }
   0x3   :  { %p548_p1 = scmp.lt.u32.totalorder %s544_s28, %s734_s3 }
   0x5   :  { %p550_p2 = pnand %p548_p1, %p545_p0 }
   0x7   :  { %553 = shalt.err (!%p550_p2)
}
   0x8   :  { %s554_s10 = scalar_lea.vmem %s26_s25, 1024  ;;  %p559_p4 = scmp.lt.s32.totalorder %s26_s25, %s26_s25 }
   0x9   :  { %p555_p3 = scmp.ne.s32.totalorder %s26_s25, %s554_s10  ;;  %p560_p5 = scmp.lt.s32.totalorder %s554_s10, %s554_s10 }
   0xb   :  { %p561_p6 = por %p560_p5, %p559_p4 }
   0xd   :  { %p562_p7 = pnand %p561_p6, %p555_p3 }
   0xf   :  { %565 = shalt.err (!%p562_p7)
}
  0x10   :  { %s593_s11 = smov 64   ;;  %s594_s12 = smov 4  }
  0x11   :  { %31 = dma.hbm_to_vmem [thread:$0]  %s734_s3, 1024, %s26_s25, [#allocation3], %s593_s11, %s593_s11, %s594_s12  }
  0x12   :  { %s595_s15 = smov [#allocation4]   ;;  %s566_s19 = scalar_lea.hbm %s736_s5, 1024 }
  0x13   :  { %s39_s16 = sshll.u32 %s595_s15, 4  ;;  %p567_p8 = scmp.ne.s32.totalorder %s736_s5, %s566_s19  ;;  %s40_s16 = int_to_ptr.vmem [resolvable:$true] %s39_s16 }
  0x14   :  { %p570_p9 = scmp.lt.u32.totalorder %s566_s19, %s736_s5 }
  0x16   :  { %p572_p10 = pnand %p570_p9, %p567_p8 }
  0x18   :  { %575 = shalt.err (!%p572_p10)
}
  0x19   :  { %s576_s24 = scalar_lea.vmem %s40_s16, 1024  ;;  %p581_p12 = scmp.lt.s32.totalorder %s40_s16, %s40_s16 }
  0x1a   :  { %p577_p11 = scmp.ne.s32.totalorder %s40_s16, %s576_s24  ;;  %p582_p13 = scmp.lt.s32.totalorder %s576_s24, %s576_s24 }
  0x1c   :  { %p583_p0 = por %p582_p13, %p581_p12 }
  0x1e   :  { %p584_p1 = pnand %p583_p0, %p577_p11 }
  0x20   :  { %587 = shalt.err (!%p584_p1)
}
  0x21   :  { %45 = dma.hbm_to_vmem [thread:$0]  %s736_s5, 1024, %s40_s16, [#allocation5], %s593_s11, %s593_s11, %s594_s12  }
  0x22   :  { %588 = dma.done.wait [#allocation3], 1024  }
  0x23   :  { %589 = vsyncadd [#allocation3], 4294966272 }
  0x24   :  { %590 = dma.done.wait [#allocation5], 1024  }
  0x25   :  { %591 = vsyncadd [#allocation5], 4294966272  ;;  %v596_v0 = vmov 0.0   ;;  %vm597_vm0 = vmmov 0   ;;  %v520_v1 = vld [vmem:[%s732_s1] sm:$0xff]   ;;  %v521_v2 = vld [vmem:[%s732_s1 + $0x8] sm:$0xff]  }
  0x26   :  { %454 = vmatprep.subr.bf16.mxu0 %v596_v0  ;;  %470 = vmatprep.mubr.msk.bf16.mxu0 %vm597_vm0, %v596_v0  ;;  %v522_v3 = vld [vmem:[%s732_s1 + $0x10] sm:$0xff]   ;;  %v528_v4 = vld [vmem:[#allocation2] sm:$0xff]   ;;  %v523_v5 = vld [vmem:[%s732_s1 + $0x18] sm:$0xff]  }
  0x27   :  { %474 = vmatprep.subr.bf16.mxu1 %v596_v0  ;;  %490 = vmatprep.mubr.msk.bf16.mxu1 %vm597_vm0, %v596_v0  ;;  %v529_v6 = vld [vmem:[#allocation2 + $0x8] sm:$0xff]   ;;  %v524_v7 = vld [vmem:[%s732_s1 + $0x20] sm:$0xff]   ;;  %v530_v8 = vld [vmem:[#allocation2 + $0x10] sm:$0xff]  }
  0x28   :  { %455 = vmatpush3.bf16.msra.mxu0 %v520_v1  ;;  %475 = vmatpush3.bf16.msra.mxu1 %v528_v4  ;;  %v525_v9 = vld [vmem:[%s732_s1 + $0x28] sm:$0xff]   ;;  %v531_v10 = vld [vmem:[#allocation2 + $0x18] sm:$0xff]   ;;  %v526_v11 = vld [vmem:[%s732_s1 + $0x30] sm:$0xff]  }
  0x29   :  { %456 = vmatprep.subr.bf16.mxu0 %v596_v0  ;;  %476 = vmatprep.subr.bf16.mxu1 %v596_v0  ;;  %v532_v12 = vld [vmem:[#allocation2 + $0x20] sm:$0xff]   ;;  %v527_v13 = vld [vmem:[%s732_s1 + $0x38] sm:$0xff]   ;;  %v533_v14 = vld [vmem:[#allocation2 + $0x28] sm:$0xff]  }
  0x2a   :  { %v55_v15 = vld [vmem:[%s731_s0] sm:$0xf]  ;;  %v534_v16 = vld [vmem:[#allocation2 + $0x30] sm:$0xff]   ;;  %v535_v17 = vld [vmem:[#allocation2 + $0x38] sm:$0xff]  }
  0x2b   :  { %v536_v18 = vld [vmem:[#allocation4] sm:$0xff]   ;;  %v537_v19 = vld [vmem:[#allocation4 + $0x8] sm:$0xff]   ;;  %v538_v20 = vld [vmem:[#allocation4 + $0x10] sm:$0xff]  }
  0x2c   :  { %457 = vmatpush3.bf16.msra.mxu0 %v521_v2  ;;  %477 = vmatpush3.bf16.msra.mxu1 %v529_v6  ;;  %v539_v21 = vld [vmem:[#allocation4 + $0x18] sm:$0xff]   ;;  %v540_v22 = vld [vmem:[#allocation4 + $0x20] sm:$0xff]   ;;  %v541_v23 = vld [vmem:[#allocation4 + $0x28] sm:$0xff]  }
  0x2d   :  { %458 = vmatprep.subr.bf16.mxu0 %v596_v0  ;;  %478 = vmatprep.subr.bf16.mxu1 %v596_v0  ;;  %v400_v24 = vld [vmem:[%s733_s2] ss:$0 sm:$0xff]  ;;  %v542_v32 = vld [vmem:[#allocation4 + $0x30] sm:$0xff]   ;;  %v543_v33 = vld [vmem:[#allocation4 + $0x38] sm:$0xff]  }
  0x2e   :  { %v409_v34 = vld [vmem:[%s735_s4] ss:$0 sm:$0xff] }
  0x2f   :  { %v418_v42 = vld [vmem:[%s737_s6] ss:$0 sm:$0xff] }
  0x30   :  { %459 = vmatpush3.bf16.msra.mxu0 %v522_v3  ;;  %479 = vmatpush3.bf16.msra.mxu1 %v530_v8 }
  0x31   :  { %460 = vmatprep.subr.bf16.mxu0 %v596_v0  ;;  %480 = vmatprep.subr.bf16.mxu1 %v596_v0 }
  0x34   :  { %461 = vmatpush3.bf16.msra.mxu0 %v523_v5  ;;  %481 = vmatpush3.bf16.msra.mxu1 %v531_v10 }
  0x35   :  { %462 = vmatprep.subr.bf16.mxu0 %v596_v0  ;;  %482 = vmatprep.subr.bf16.mxu1 %v596_v0 }
  0x38   :  { %463 = vmatpush3.bf16.msra.mxu0 %v524_v7  ;;  %483 = vmatpush3.bf16.msra.mxu1 %v532_v12 }
  0x39   :  { %464 = vmatprep.subr.bf16.mxu0 %v596_v0  ;;  %484 = vmatprep.subr.bf16.mxu1 %v596_v0 }
  0x3c   :  { %465 = vmatpush3.bf16.msra.mxu0 %v525_v9  ;;  %485 = vmatpush3.bf16.msra.mxu1 %v533_v14 }
  0x3d   :  { %466 = vmatprep.subr.bf16.mxu0 %v596_v0  ;;  %486 = vmatprep.subr.bf16.mxu1 %v596_v0 }
  0x40   :  { %467 = vmatpush3.bf16.msra.mxu0 %v526_v11  ;;  %487 = vmatpush3.bf16.msra.mxu1 %v534_v16 }
  0x41   :  { %468 = vmatprep.subr.bf16.mxu0 %v596_v0  ;;  %488 = vmatprep.subr.bf16.mxu1 %v596_v0 }
  0x44   :  { %469 = vmatpush3.bf16.msra.mxu0 %v527_v13  ;;  %489 = vmatpush3.bf16.msra.mxu1 %v535_v17 }
  0x45   :  { %494 = vmatprep.subr.bf16.mxu0 %v596_v0 }
  0x47   :  { %471 = vmatmul.mubr.bf16.vlgmr.msra.gmra.mrb[0].mxu0 %v55_v15 }
  0x48   :  { %510 = vmatprep.mubr.msk.bf16.mxu0 %vm597_vm0, %v596_v0  ;;  %495 = vmatpush3.bf16.msra.mxu0 %v536_v18 }
  0x49   :  { %496 = vmatprep.subr.bf16.mxu0 %v596_v0 }
  0x4c   :  { %497 = vmatpush3.bf16.msra.mxu0 %v537_v19 }
  0x4d   :  { %498 = vmatprep.subr.bf16.mxu0 %v596_v0 }
  0x50   :  { %499 = vmatpush3.bf16.msra.mxu0 %v538_v20 }
  0x51   :  { %500 = vmatprep.subr.bf16.mxu0 %v596_v0 }
  0x54   :  { %501 = vmatpush3.bf16.msra.mxu0 %v539_v21 }
  0x55   :  { %502 = vmatprep.subr.bf16.mxu0 %v596_v0 }
  0x58   :  { %503 = vmatpush3.bf16.msra.mxu0 %v540_v22 }
  0x59   :  { %504 = vmatprep.subr.bf16.mxu0 %v596_v0 }
  0x5c   :  { %505 = vmatpush3.bf16.msra.mxu0 %v541_v23 }
  0x5d   :  { %506 = vmatprep.subr.bf16.mxu0 %v596_v0 }
  0x60   :  { %507 = vmatpush3.bf16.msra.mxu0 %v542_v32 }
  0x61   :  { %508 = vmatprep.subr.bf16.mxu0 %v596_v0 }
  0x64   :  { %509 = vmatpush3.bf16.msra.mxu0 %v543_v33 }
 0x11a   :  { %v161_v25 = vpop.f32.mrb[0].mxu0 }
 0x11b   :  { %v162_v26 = vadd.f32 %v400_v24, %v161_v25  ;;  %v472_v27 = vpop.f32.mrb[1].mxu0 }
 0x11c   :  { %v164_v28 = vpop.f32.mrb[2].mxu0 }
 0x11d   :  { %v167_v29 = vmax.f32 %v162_v26, 0.0  ;;  %v473_v30 = vpop.f32.mrb[3].mxu0 }
 0x11f   :  { %v168_v31 = vpack.c.bf16 %v167_v29, %v167_v29 }
 0x121   :  { %491 = vmatmul.mubr.bf16.vlgmr.msra.gmra.mrb[0].mxu1 %v168_v31 }
 0x1f4   :  { %v274_v35 = vpop.f32.mrb[0].mxu1 }
 0x1f5   :  { %v275_v36 = vadd.f32 %v409_v34, %v274_v35  ;;  %v492_v37 = vpop.f32.mrb[1].mxu1 }
 0x1f6   :  { %v277_v38 = vpop.f32.mrb[2].mxu1 }
 0x1f7   :  { %v280_v39 = vmax.f32 %v275_v36, 0.0  ;;  %v493_v40 = vpop.f32.mrb[3].mxu1 }
 0x1f9   :  { %v281_v41 = vpack.c.bf16 %v280_v39, %v280_v39 }
 0x1fb   :  { %511 = vmatmul.mubr.bf16.vlgmr.msra.gmra.mrb[4].mxu0 %v281_v41 }
 0x2ce   :  { %v387_v43 = vpop.f32.mrb[4].mxu0 }
 0x2cf   :  { %v388_v44 = vadd.f32 %v418_v42, %v387_v43  ;;  %v512_v45 = vpop.f32.mrb[5].mxu0 }
 0x2d0   :  { %v390_v46 = vpop.f32.mrb[6].mxu0 }
 0x2d1   :  { %393 = vst [vmem:[%s738_s7] sm:$0xff] %v388_v44  ;;  %v513_v47 = vpop.f32.mrb[7].mxu0 }
 0x2d2   :  { %398 = vsyncpa [#allocation3], 1 }
 0x2d3   :  { %399 = vsyncpa [#allocation5], 1 }

</bundles_post_ra>
